<compile_context>
chip_gen: v5e
topology: v5e:2x2
jax: 0.10.0
libtpu: 0.0.40
codegen_flags: <defaults>
</compile_context>

<pallas_src>
import functools

import jax
import jax.numpy as jnp
from jax.experimental import pallas as pl
from jax.experimental.pallas import tpu as pltpu

EPS = 1e-5


def _resnet_block_kernel(x_ref, w1_ref, w2_ref, g_ref, o_ref):
    # x_ref/o_ref: (H, WCP) lane-dense rows; WCP = n_pack * W * C (two images
    #              packed along lanes for the default config).
    # w1_ref/w2_ref: (WCP, 3*WCP) bf16 fused conv weights. Column groups:
    #              [0:WCP] kh=0 tap, [WCP:2*WCP] kh=1 tap, [2*WCP:] kh=2 tap.
    #              kw taps + W-direction reflect padding are folded in; the
    #              matrices are block-diagonal over the packed images.
    # g_ref:       (WCP, WCP) f32 per-(image, channel) averaging matrix.
    H, WCP = x_ref.shape
    x = x_ref[...]                 # f32
    g = g_ref[...]                 # f32, hoisted (used by both IN stages)
    row = jax.lax.broadcasted_iota(jnp.int32, (H, WCP), 0)

    def conv3x3(a, w_ref):
        # One fused MXU matmul for all three kh taps (bf16 operands, f32 acc).
        z = jnp.dot(a.astype(jnp.bfloat16), w_ref[...],
                    preferred_element_type=jnp.float32)        # (H, 3*WCP)
        z0 = z[:, 0:WCP]                 # kh=0 contribution (needs "up" shift)
        z1 = z[:, WCP:2 * WCP]           # kh=1 contribution (no shift)
        z2 = z[:, 2 * WCP:3 * WCP]       # kh=2 contribution (needs "down" shift)
        # Reflect row-shifts applied to the tap OUTPUTS on the XLU slot.
        up = pltpu.roll(z0, shift=1, axis=0)           # up[h] = z0[h-1 mod H]
        up = jnp.where(row == 0, z0[1:2, :], up)       # reflect: row 0 <- z0[1]
        dn = pltpu.roll(z2, shift=H - 1, axis=0)       # dn[h] = z2[h+1 mod H]
        dn = jnp.where(row == H - 1, z2[H - 2:H - 1, :], dn)   # last <- z2[H-2]
        return up + z1 + dn

    def instance_norm(y):
        # One-pass per-(image, channel) stats over (H, W), kept lane-dense:
        # reduce over rows, then one small f32 matmul with G averages lanes of
        # the same (image, channel) and broadcasts back to every lane.
        s1 = jnp.sum(y, axis=0, keepdims=True)          # (1, WCP)
        s2 = jnp.sum(y * y, axis=0, keepdims=True)      # (1, WCP)
        st = jnp.concatenate([s1, s2], axis=0)          # (2, WCP)
        stg = jnp.dot(st, g, preferred_element_type=jnp.float32)
        mean = stg[0:1, :]
        var = jnp.maximum(stg[1:2, :] - mean * mean, 0.0)
        return (y - mean) * jax.lax.rsqrt(var + EPS)

    # stage 1: (reflect pad) conv -> IN -> ReLU    (use_dropout=False)
    h1 = jnp.maximum(instance_norm(conv3x3(x, w1_ref)), 0.0)
    # stage 2: (reflect pad) conv -> IN
    h2 = instance_norm(conv3x3(h1, w2_ref))
    # residual connection
    o_ref[...] = x + h2


def _fold_conv_weights(w_hwio, Wd, C, n_pack):
    """Fold kw taps + W-reflect padding into a fused (WCP, 3*WCP) RHS.

    Per image, per kh tap:
      M_kh[wi*C+ci, wo*C+co] = sum_{kw : reflectW(wo+kw-1) == wi} w[kh,kw,ci,co]
    Each tap matrix is made block-diagonal over the n_pack lane-packed images
    and the three taps are concatenated along the output (lane) axis.
    """
    wo = jnp.arange(Wd)
    rows = jnp.arange(Wd)[:, None]
    eye = jnp.eye(n_pack, dtype=jnp.float32)
    taps = []
    for kh in range(3):
        m = jnp.zeros((Wd * C, Wd * C), jnp.float32)
        for kw in range(3):
            wp = wo + kw - 1                                   # padded coord - 1
            wi = jnp.where(wp < 0, -wp,
                           jnp.where(wp > Wd - 1, 2 * (Wd - 1) - wp, wp))
            sel = (wi[None, :] == rows).astype(jnp.float32)    # (Wd, Wd): [wi, wo]
            m = m + jnp.kron(sel, w_hwio[kh, kw].astype(jnp.float32))
        taps.append(jnp.kron(eye, m))          # block-diag over packed images
    return jnp.concatenate(taps, axis=1)       # (n_pack*Wd*C, 3*n_pack*Wd*C)


def make_resnet_block_params(w1_hwio, w2_hwio, H, W, C, n_pack):
    """Precompute folded conv weights (bf16) and the IN grouping matrix ONCE."""
    WCP = n_pack * W * C
    w1m = _fold_conv_weights(w1_hwio, W, C, n_pack).astype(jnp.bfloat16)
    w2m = _fold_conv_weights(w2_hwio, W, C, n_pack).astype(jnp.bfloat16)
    lane = jnp.arange(WCP)
    same_img = (lane[:, None] // (W * C)) == (lane[None, :] // (W * C))
    same_ch = (lane[:, None] % C) == (lane[None, :] % C)
    g = (same_img & same_ch).astype(jnp.float32) / float(H * W)
    return w1m, w2m, g


@functools.partial(jax.jit, static_argnames=("n_pack",))
def resnet_block_pallas(x_nhwc, w1m, w2m, g, *, n_pack=2):
    """x_nhwc: (N, H, W, C) float32; params from make_resnet_block_params."""
    N, H, W, C = x_nhwc.shape
    assert N % n_pack == 0 and H >= 2 and W >= 2
    WCP = n_pack * W * C
    G = N // n_pack

    # Pack n_pack images per lane row: (G*H, n_pack*W*C) lane-dense slab.
    x2d = (x_nhwc.astype(jnp.float32)
           .reshape(G, n_pack, H, W * C)
           .transpose(0, 2, 1, 3)
           .reshape(G * H, WCP))

    grid_spec = pltpu.PrefetchScalarGridSpec(
        num_scalar_prefetch=0,
        grid=(G,),
        in_specs=[
            pl.BlockSpec((H, WCP), lambda b: (b, 0)),          # packed images
            pl.BlockSpec((WCP, 3 * WCP), lambda b: (0, 0)),    # resident weights
            pl.BlockSpec((WCP, 3 * WCP), lambda b: (0, 0)),
            pl.BlockSpec((WCP, WCP), lambda b: (0, 0)),
        ],
        out_specs=pl.BlockSpec((H, WCP), lambda b: (b, 0)),
    )
    out2d = pl.pallas_call(
        _resnet_block_kernel,
        out_shape=jax.ShapeDtypeStruct((G * H, WCP), jnp.float32),
        grid_spec=grid_spec,
        compiler_params=pltpu.CompilerParams(
            dimension_semantics=("parallel",),
            vmem_limit_bytes=32 * 1024 * 1024),
    )(x2d, w1m, w2m, g)

    return (out2d.reshape(G, H, n_pack, W * C)
            .transpose(0, 2, 1, 3)
            .reshape(N, H, W, C))


# ---------------- pure-JAX reference (verification only) ----------------
def _ref_forward(x_nhwc, w1_hwio, b1, w2_hwio, b2):
    def reflect_pad(x):
        return jnp.pad(x, ((0, 0), (1, 1), (1, 1), (0, 0)), mode="reflect")

    def conv(x, w, b):
        y = jax.lax.conv_general_dilated(
            x, w, window_strides=(1, 1), padding="VALID",
            dimension_numbers=("NHWC", "HWIO", "NHWC"))
        return y + b.reshape(1, 1, 1, -1)

    def inorm(x):
        mu = jnp.mean(x, axis=(1, 2), keepdims=True)
        var = jnp.mean((x - mu) ** 2, axis=(1, 2), keepdims=True)
        return (x - mu) / jnp.sqrt(var + EPS)

    h = jnp.maximum(inorm(conv(reflect_pad(x_nhwc), w1_hwio, b1)), 0.0)
    h = inorm(conv(reflect_pad(h), w2_hwio, b2))
    return x_nhwc + h


if __name__ == "__main__":
    N, C, H, W = 2, 4, 16, 16  # PyTorch NCHW: x is (2, 4, 16, 16)

    key = jax.random.PRNGKey(0)
    kx, kw1, kb1, kw2, kb2 = jax.random.split(key, 5)

    x_nchw = jax.random.normal(kx, (N, C, H, W), dtype=jnp.float32)
    x_nhwc = jnp.transpose(x_nchw, (0, 2, 3, 1))  # layout glue: NCHW -> NHWC

    # Synthetic parameters in HWIO (equivalent to torch OIHW via
    # w_hwio[kh, kw, ci, co] == w_torch[co, ci, kh, kw]).
    w1 = 0.1 * jax.random.normal(kw1, (3, 3, C, C), dtype=jnp.float32)
    b1 = 0.1 * jax.random.normal(kb1, (C,), dtype=jnp.float32)
    w2 = 0.1 * jax.random.normal(kw2, (3, 3, C, C), dtype=jnp.float32)
    b2 = 0.1 * jax.random.normal(kb2, (C,), dtype=jnp.float32)

    # Fold/pack the parameters once (init-time work, not per forward call).
    n_pack = 2 if N % 2 == 0 else 1
    w1m, w2m, g = make_resnet_block_params(w1, w2, H, W, C, n_pack)

    # Kernel: conv biases omitted (cancelled exactly by InstanceNorm affine=False).
    out = resnet_block_pallas(x_nhwc, w1m, w2m, g, n_pack=n_pack)
    out = jax.block_until_ready(out)

    # Reference includes the biases to verify the cancellation claim.
    # Tolerance is set by the bf16 MXU operands (structural bugs show up as
    # O(0.3+) errors, far above this bound).
    ref = _ref_forward(x_nhwc, w1, b1, w2, b2)
    assert out.shape == (N, H, W, C)
    assert jnp.allclose(out, ref, atol=3e-2, rtol=3e-2), (
        "mismatch vs reference, max abs diff = "
        f"{float(jnp.max(jnp.abs(out - ref)))}")

    print("KERNEL_OK")
</pallas_src>

<mosaic_0001>
module attributes {stable_mosaic.version = 11 : i64} {
  func.func @_resnet_block_kernel(%arg0: i32, %arg1: memref<16x128xf32, #tpu.memory_space<vmem>>, %arg2: memref<128x384xbf16, #tpu.memory_space<vmem>>, %arg3: memref<128x384xbf16, #tpu.memory_space<vmem>>, %arg4: memref<128x128xf32, #tpu.memory_space<vmem>>, %arg5: memref<16x128xf32, #tpu.memory_space<vmem>>) attributes {dimension_semantics = [#tpu.dimension_semantics<parallel>], iteration_bounds = array<i64: 1>, scalar_prefetch = 0 : i64, scratch_operands = 0 : i64, tpu.core_type = #tpu.core_type<tc>, window_params = [{transform_indices = @transform_0, window_bounds = array<i64: 16, 128>}, {pipeline_mode = #tpu.pipeline_mode<synchronous>, transform_indices = @transform_1, window_bounds = array<i64: 128, 384>}, {pipeline_mode = #tpu.pipeline_mode<synchronous>, transform_indices = @transform_2, window_bounds = array<i64: 128, 384>}, {pipeline_mode = #tpu.pipeline_mode<synchronous>, transform_indices = @transform_3, window_bounds = array<i64: 128, 128>}, {transform_indices = @transform_4, window_bounds = array<i64: 16, 128>}]} {
    %c0 = arith.constant 0 : index
    %c0_0 = arith.constant 0 : index
    %0 = vector.load %arg1[%c0, %c0_0] : memref<16x128xf32, #tpu.memory_space<vmem>>, vector<16x128xf32>
    %c0_1 = arith.constant 0 : index
    %c0_2 = arith.constant 0 : index
    %1 = vector.load %arg4[%c0_1, %c0_2] : memref<128x128xf32, #tpu.memory_space<vmem>>, vector<128x128xf32>
    %2 = tpu.iota {dimensions = array<i32: 0>} : vector<16x128xi32>
    %3 = arith.truncf %0 : vector<16x128xf32> to vector<16x128xbf16>
    %c0_3 = arith.constant 0 : index
    %c0_4 = arith.constant 0 : index
    %4 = vector.load %arg2[%c0_3, %c0_4] : memref<128x384xbf16, #tpu.memory_space<vmem>>, vector<128x384xbf16>
    %cst = arith.constant dense<0.000000e+00> : vector<16x384xf32>
    %5 = tpu.matmul %3, %4, %cst {dimension_numbers = #tpu.dot_dimension_numbers<[1], [0], [0], [1], [0, 0, 1, 1], [], []>} : vector<16x128xbf16>, vector<128x384xbf16>, vector<16x384xf32> -> vector<16x384xf32>
    %6 = vector.extract_strided_slice %5 {offsets = [0, 0], sizes = [16, 128], strides = [1, 1]} : vector<16x384xf32> to vector<16x128xf32>
    %7 = vector.extract_strided_slice %5 {offsets = [0, 128], sizes = [16, 128], strides = [1, 1]} : vector<16x384xf32> to vector<16x128xf32>
    %8 = vector.extract_strided_slice %5 {offsets = [0, 256], sizes = [16, 128], strides = [1, 1]} : vector<16x384xf32> to vector<16x128xf32>
    %c1_i32 = arith.constant 1 : i32
    %9 = tpu.dynamic_rotate %6 by %c1_i32 dim 0 : vector<16x128xf32>, i32 -> vector<16x128xf32>
    %c0_i32 = arith.constant 0 : i32
    %10 = vector.broadcast %c0_i32 : i32 to vector<16x128xi32>
    %11 = arith.cmpi eq, %2, %10 : vector<16x128xi32>
    %12 = vector.extract_strided_slice %6 {offsets = [1, 0], sizes = [1, 128], strides = [1, 1]} : vector<16x128xf32> to vector<1x128xf32>
    %13 = vector.shape_cast %12 : vector<1x128xf32> to vector<1x128xf32>
    %14 = vector.broadcast %13 : vector<1x128xf32> to vector<16x128xf32>
    %15 = arith.select %11, %14, %9 : vector<16x128xi1>, vector<16x128xf32>
    %c15_i32 = arith.constant 15 : i32
    %16 = tpu.dynamic_rotate %8 by %c15_i32 dim 0 : vector<16x128xf32>, i32 -> vector<16x128xf32>
    %c15_i32_5 = arith.constant 15 : i32
    %17 = vector.broadcast %c15_i32_5 : i32 to vector<16x128xi32>
    %18 = arith.cmpi eq, %2, %17 : vector<16x128xi32>
    %19 = vector.extract_strided_slice %8 {offsets = [14, 0], sizes = [1, 128], strides = [1, 1]} : vector<16x128xf32> to vector<1x128xf32>
    %20 = vector.shape_cast %19 : vector<1x128xf32> to vector<1x128xf32>
    %21 = vector.broadcast %20 : vector<1x128xf32> to vector<16x128xf32>
    %22 = arith.select %18, %21, %16 : vector<16x128xi1>, vector<16x128xf32>
    %23 = arith.addf %15, %7 : vector<16x128xf32>
    %24 = arith.addf %23, %22 : vector<16x128xf32>
    %cst_6 = arith.constant dense<0.000000e+00> : vector<128xf32>
    %25 = vector.multi_reduction <add>, %24, %cst_6 [0] : vector<16x128xf32> to vector<128xf32>
    %26 = vector.shape_cast %25 : vector<128xf32> to vector<1x128xf32>
    %27 = arith.mulf %24, %24 : vector<16x128xf32>
    %cst_7 = arith.constant dense<0.000000e+00> : vector<128xf32>
    %28 = vector.multi_reduction <add>, %27, %cst_7 [0] : vector<16x128xf32> to vector<128xf32>
    %29 = vector.shape_cast %28 : vector<128xf32> to vector<1x128xf32>
    %30 = tpu.concatenate %26, %29 in 0 : vector<1x128xf32>, vector<1x128xf32> -> vector<2x128xf32>
    %cst_8 = arith.constant dense<0.000000e+00> : vector<2x128xf32>
    %31 = tpu.matmul %30, %1, %cst_8 {dimension_numbers = #tpu.dot_dimension_numbers<[1], [0], [0], [1], [0, 0, 1, 1], [], []>} : vector<2x128xf32>, vector<128x128xf32>, vector<2x128xf32> -> vector<2x128xf32>
    %32 = vector.extract_strided_slice %31 {offsets = [0, 0], sizes = [1, 128], strides = [1, 1]} : vector<2x128xf32> to vector<1x128xf32>
    %33 = vector.extract_strided_slice %31 {offsets = [1, 0], sizes = [1, 128], strides = [1, 1]} : vector<2x128xf32> to vector<1x128xf32>
    %34 = arith.mulf %32, %32 : vector<1x128xf32>
    %35 = arith.subf %33, %34 : vector<1x128xf32>
    %cst_9 = arith.constant 0.000000e+00 : f32
    %36 = vector.broadcast %cst_9 : f32 to vector<1x128xf32>
    %37 = arith.maximumf %35, %36 : vector<1x128xf32>
    %38 = vector.broadcast %32 : vector<1x128xf32> to vector<16x128xf32>
    %39 = arith.subf %24, %38 : vector<16x128xf32>
    %cst_10 = arith.constant 9.99999974E-6 : f32
    %40 = vector.broadcast %cst_10 : f32 to vector<1x128xf32>
    %41 = arith.addf %37, %40 : vector<1x128xf32>
    %42 = math.rsqrt %41 : vector<1x128xf32>
    %43 = vector.broadcast %42 : vector<1x128xf32> to vector<16x128xf32>
    %44 = arith.mulf %39, %43 : vector<16x128xf32>
    %cst_11 = arith.constant 0.000000e+00 : f32
    %45 = vector.broadcast %cst_11 : f32 to vector<16x128xf32>
    %46 = arith.maximumf %44, %45 : vector<16x128xf32>
    %47 = arith.truncf %46 : vector<16x128xf32> to vector<16x128xbf16>
    %c0_12 = arith.constant 0 : index
    %c0_13 = arith.constant 0 : index
    %48 = vector.load %arg3[%c0_12, %c0_13] : memref<128x384xbf16, #tpu.memory_space<vmem>>, vector<128x384xbf16>
    %cst_14 = arith.constant dense<0.000000e+00> : vector<16x384xf32>
    %49 = tpu.matmul %47, %48, %cst_14 {dimension_numbers = #tpu.dot_dimension_numbers<[1], [0], [0], [1], [0, 0, 1, 1], [], []>} : vector<16x128xbf16>, vector<128x384xbf16>, vector<16x384xf32> -> vector<16x384xf32>
    %50 = vector.extract_strided_slice %49 {offsets = [0, 0], sizes = [16, 128], strides = [1, 1]} : vector<16x384xf32> to vector<16x128xf32>
    %51 = vector.extract_strided_slice %49 {offsets = [0, 128], sizes = [16, 128], strides = [1, 1]} : vector<16x384xf32> to vector<16x128xf32>
    %52 = vector.extract_strided_slice %49 {offsets = [0, 256], sizes = [16, 128], strides = [1, 1]} : vector<16x384xf32> to vector<16x128xf32>
    %c1_i32_15 = arith.constant 1 : i32
    %53 = tpu.dynamic_rotate %50 by %c1_i32_15 dim 0 : vector<16x128xf32>, i32 -> vector<16x128xf32>
    %c0_i32_16 = arith.constant 0 : i32
    %54 = vector.broadcast %c0_i32_16 : i32 to vector<16x128xi32>
    %55 = arith.cmpi eq, %2, %54 : vector<16x128xi32>
    %56 = vector.extract_strided_slice %50 {offsets = [1, 0], sizes = [1, 128], strides = [1, 1]} : vector<16x128xf32> to vector<1x128xf32>
    %57 = vector.shape_cast %56 : vector<1x128xf32> to vector<1x128xf32>
    %58 = vector.broadcast %57 : vector<1x128xf32> to vector<16x128xf32>
    %59 = arith.select %55, %58, %53 : vector<16x128xi1>, vector<16x128xf32>
    %c15_i32_17 = arith.constant 15 : i32
    %60 = tpu.dynamic_rotate %52 by %c15_i32_17 dim 0 : vector<16x128xf32>, i32 -> vector<16x128xf32>
    %c15_i32_18 = arith.constant 15 : i32
    %61 = vector.broadcast %c15_i32_18 : i32 to vector<16x128xi32>
    %62 = arith.cmpi eq, %2, %61 : vector<16x128xi32>
    %63 = vector.extract_strided_slice %52 {offsets = [14, 0], sizes = [1, 128], strides = [1, 1]} : vector<16x128xf32> to vector<1x128xf32>
    %64 = vector.shape_cast %63 : vector<1x128xf32> to vector<1x128xf32>
    %65 = vector.broadcast %64 : vector<1x128xf32> to vector<16x128xf32>
    %66 = arith.select %62, %65, %60 : vector<16x128xi1>, vector<16x128xf32>
    %67 = arith.addf %59, %51 : vector<16x128xf32>
    %68 = arith.addf %67, %66 : vector<16x128xf32>
    %cst_19 = arith.constant dense<0.000000e+00> : vector<128xf32>
    %69 = vector.multi_reduction <add>, %68, %cst_19 [0] : vector<16x128xf32> to vector<128xf32>
    %70 = vector.shape_cast %69 : vector<128xf32> to vector<1x128xf32>
    %71 = arith.mulf %68, %68 : vector<16x128xf32>
    %cst_20 = arith.constant dense<0.000000e+00> : vector<128xf32>
    %72 = vector.multi_reduction <add>, %71, %cst_20 [0] : vector<16x128xf32> to vector<128xf32>
    %73 = vector.shape_cast %72 : vector<128xf32> to vector<1x128xf32>
    %74 = tpu.concatenate %70, %73 in 0 : vector<1x128xf32>, vector<1x128xf32> -> vector<2x128xf32>
    %cst_21 = arith.constant dense<0.000000e+00> : vector<2x128xf32>
    %75 = tpu.matmul %74, %1, %cst_21 {dimension_numbers = #tpu.dot_dimension_numbers<[1], [0], [0], [1], [0, 0, 1, 1], [], []>} : vector<2x128xf32>, vector<128x128xf32>, vector<2x128xf32> -> vector<2x128xf32>
    %76 = vector.extract_strided_slice %75 {offsets = [0, 0], sizes = [1, 128], strides = [1, 1]} : vector<2x128xf32> to vector<1x128xf32>
    %77 = vector.extract_strided_slice %75 {offsets = [1, 0], sizes = [1, 128], strides = [1, 1]} : vector<2x128xf32> to vector<1x128xf32>
    %78 = arith.mulf %76, %76 : vector<1x128xf32>
    %79 = arith.subf %77, %78 : vector<1x128xf32>
    %cst_22 = arith.constant 0.000000e+00 : f32
    %80 = vector.broadcast %cst_22 : f32 to vector<1x128xf32>
    %81 = arith.maximumf %79, %80 : vector<1x128xf32>
    %82 = vector.broadcast %76 : vector<1x128xf32> to vector<16x128xf32>
    %83 = arith.subf %68, %82 : vector<16x128xf32>
    %cst_23 = arith.constant 9.99999974E-6 : f32
    %84 = vector.broadcast %cst_23 : f32 to vector<1x128xf32>
    %85 = arith.addf %81, %84 : vector<1x128xf32>
    %86 = math.rsqrt %85 : vector<1x128xf32>
    %87 = vector.broadcast %86 : vector<1x128xf32> to vector<16x128xf32>
    %88 = arith.mulf %83, %87 : vector<16x128xf32>
    %89 = arith.addf %0, %88 : vector<16x128xf32>
    %c0_24 = arith.constant 0 : index
    %c0_25 = arith.constant 0 : index
    %90 = vector.load %arg5[%c0_24, %c0_25] : memref<16x128xf32, #tpu.memory_space<vmem>>, vector<16x128xf32>
    tpu.vector_store %arg5[%c0_24, %c0_25], %89 {strides = array<i32>} : memref<16x128xf32, #tpu.memory_space<vmem>>, vector<16x128xf32>,
    return
  }
  func.func @transform_0(%arg0: i32) -> (i32, i32) {
    %c0_i32 = arith.constant 0 : i32
    %c0_i32_0 = arith.constant 0 : i32
    return %arg0, %c0_i32 : i32, i32
  }
  func.func @transform_1(%arg0: i32) -> (i32, i32) {
    %c0_i32 = arith.constant 0 : i32
    %c0_i32_0 = arith.constant 0 : i32
    %c0_i32_1 = arith.constant 0 : i32
    return %c0_i32, %c0_i32_0 : i32, i32
  }
  func.func @transform_2(%arg0: i32) -> (i32, i32) {
    %c0_i32 = arith.constant 0 : i32
    %c0_i32_0 = arith.constant 0 : i32
    %c0_i32_1 = arith.constant 0 : i32
    return %c0_i32, %c0_i32_0 : i32, i32
  }
  func.func @transform_3(%arg0: i32) -> (i32, i32) {
    %c0_i32 = arith.constant 0 : i32
    %c0_i32_0 = arith.constant 0 : i32
    %c0_i32_1 = arith.constant 0 : i32
    return %c0_i32, %c0_i32_0 : i32, i32
  }
  func.func @transform_4(%arg0: i32) -> (i32, i32) {
    %c0_i32 = arith.constant 0 : i32
    %c0_i32_0 = arith.constant 0 : i32
    return %arg0, %c0_i32 : i32, i32
  }
}

</mosaic_0001>

<bundles_post_ra>
// kernel: resnet_block_pallas.1
= control target key start
LH: loop header
LB: loop body
LE: loop exit
PB: predicated region body
PF: predicated region fallthrough
CT: control target
= control target key end

     0   :  { %9 = vsyncpa [#allocation3], 0  ;;  %s907_s18 = smov [#allocation2]   ;;  %s908_s20 = smov 128   ;;  %s1293_s0 = inlined_call_operand.vmem [shape: f32[16,128], index: 0, kind: input, shape index: {}]   ;;  %s1294_s1 = inlined_call_operand.vmem [shape: bf16[128,384], index: 1, kind: input, shape index: {}]   ;;  %s1295_s2 = inlined_call_operand.vmem [shape: bf16[128,384], index: 2, kind: input, shape index: {}]   ;;  %s1296_s3 = inlined_call_operand.hbm [shape: f32[128,128], index: 3, kind: input, shape index: {}]   ;;  %s1297_s4 = inlined_call_operand.vmem [shape: f32[16,128], index: 4, kind: output, shape index: {}]  }
   0x1   :  { %s20_s17 = sshll.u32 %s1296_s3, 4  ;;  %s22_s19 = sshll.u32 %s907_s18, 4  ;;  %s21_s17 = int_to_ptr.hbm [resolvable:$true] %s20_s17  ;;  %s23_s19 = int_to_ptr.vmem [resolvable:$true] %s22_s19 }
   0x2   :  { %s909_s21 = smov 8  }
   0x3   :  { %28 = dma.hbm_to_vmem [thread:$0]  %s21_s17, 2048, %s23_s19, [#allocation3], %s908_s20, %s908_s20, %s909_s21  }
   0x4   :  { %905 = dma.done.wait [#allocation3], 2048  }
   0x5   :  { %906 = vsyncadd [#allocation3], 4294965248  ;;  %v720_v0 = vld [vmem:[%s1294_s1 + $0xa8] sm:$0xf]  ;;  %v848_v1 = vld [vmem:[%s1294_s1 + $0xb0] sm:$0xf0] }
   0x6   :  { %v847_v2 = vld [vmem:[%s1294_s1 + $0xac] sm:$0xf]  ;;  %v721_v3 = vor.u32 %v848_v1, %v720_v0  ;;  %v722_v4 = vld [vmem:[%s1294_s1 + $0xb4] sm:$0xf0]  ;;  %v728_v5 = vld [vmem:[%s1294_s1 + $0xb0] sm:$0xf] }
   0x7   :  { %v849_v6 = vld [vmem:[%s1294_s1 + $0xb8] sm:$0xf0]  ;;  %v725_v7 = vor.u32 %v847_v2, %v722_v4  ;;  %v708_v9 = vld [vmem:[%s1294_s1 + $0x90] sm:$0xf]  ;;  %v844_v11 = vld [vmem:[%s1294_s1 + $0x94] sm:$0xf] }
   0x8   :  { %v729_v8 = vor.u32 %v849_v6, %v728_v5  ;;  %v845_v10 = vld [vmem:[%s1294_s1 + $0x98] sm:$0xf0]  ;;  %215 = vmatpush.bf16.msra.mxu0 %v721_v3  ;;  %v710_v13 = vld [vmem:[%s1294_s1 + $0x9c] sm:$0xf0]  ;;  %v716_v14 = vld [vmem:[%s1294_s1 + $0x98] sm:$0xf] }
   0x9   :  { %v709_v12 = vor.u32 %v845_v10, %v708_v9  ;;  %v846_v15 = vld [vmem:[%s1294_s1 + $0xa0] sm:$0xf0]  ;;  %229 = vmatpush.bf16.msra.mxu1 %v725_v7  ;;  %v713_v16 = vor.u32 %v844_v11, %v710_v13  ;;  %v696_v18 = vld [vmem:[%s1294_s1 + $0x78] sm:$0xf]  ;;  %v841_v20 = vld [vmem:[%s1294_s1 + $0x7c] sm:$0xf] }
   0xa   :  { %243 = vmatpush.bf16.msra.mxu2 %v729_v8  ;;  %v717_v17 = vor.u32 %v846_v15, %v716_v14  ;;  %v842_v19 = vld [vmem:[%s1294_s1 + $0x80] sm:$0xf0]  ;;  %v698_v21 = vld [vmem:[%s1294_s1 + $0x84] sm:$0xf0]  ;;  %v704_v22 = vld [vmem:[%s1294_s1 + $0x80] sm:$0xf] }
   0xb   :  { %v843_v23 = vld [vmem:[%s1294_s1 + $0x88] sm:$0xf0]  ;;  %v697_v24 = vor.u32 %v842_v19, %v696_v18  ;;  %v701_v25 = vor.u32 %v841_v20, %v698_v21  ;;  %v684_v27 = vld [vmem:[%s1294_s1 + $0x60] sm:$0xf]  ;;  %v838_v29 = vld [vmem:[%s1294_s1 + $0x64] sm:$0xf] }
   0xc   :  { %216 = vmatpush.bf16.msra.mxu0 %v709_v12  ;;  %v705_v26 = vor.u32 %v843_v23, %v704_v22  ;;  %v839_v28 = vld [vmem:[%s1294_s1 + $0x68] sm:$0xf0]  ;;  %v686_v30 = vld [vmem:[%s1294_s1 + $0x6c] sm:$0xf0]  ;;  %v692_v31 = vld [vmem:[%s1294_s1 + $0x68] sm:$0xf] }
   0xd   :  { %230 = vmatpush.bf16.msra.mxu1 %v713_v16  ;;  %v840_v32 = vld [vmem:[%s1294_s1 + $0x70] sm:$0xf0]  ;;  %v685_v33 = vor.u32 %v839_v28, %v684_v27  ;;  %v689_v34 = vor.u32 %v838_v29, %v686_v30  ;;  %v672_v36 = vld [vmem:[%s1294_s1 + $0x48] sm:$0xf]  ;;  %v835_v38 = vld [vmem:[%s1294_s1 + $0x4c] sm:$0xf] }
   0xe   :  { %244 = vmatpush.bf16.msra.mxu2 %v717_v17  ;;  %v693_v35 = vor.u32 %v840_v32, %v692_v31  ;;  %v836_v37 = vld [vmem:[%s1294_s1 + $0x50] sm:$0xf0]  ;;  %v674_v39 = vld [vmem:[%s1294_s1 + $0x54] sm:$0xf0]  ;;  %v680_v40 = vld [vmem:[%s1294_s1 + $0x50] sm:$0xf] }
   0xf   :  { %v837_v41 = vld [vmem:[%s1294_s1 + $0x58] sm:$0xf0]  ;;  %v673_v42 = vor.u32 %v836_v37, %v672_v36  ;;  %v677_v43 = vor.u32 %v835_v38, %v674_v39  ;;  %v660_v45 = vld [vmem:[%s1294_s1 + $0x30] sm:$0xf]  ;;  %v832_v47 = vld [vmem:[%s1294_s1 + $0x34] sm:$0xf] }
  0x10   :  { %217 = vmatpush.bf16.msra.mxu0 %v697_v24  ;;  %v681_v44 = vor.u32 %v837_v41, %v680_v40  ;;  %v833_v46 = vld [vmem:[%s1294_s1 + $0x38] sm:$0xf0]  ;;  %v662_v48 = vld [vmem:[%s1294_s1 + $0x3c] sm:$0xf0]  ;;  %v668_v49 = vld [vmem:[%s1294_s1 + $0x38] sm:$0xf] }
  0x11   :  { %231 = vmatpush.bf16.msra.mxu1 %v701_v25  ;;  %v834_v50 = vld [vmem:[%s1294_s1 + $0x40] sm:$0xf0]  ;;  %v661_v51 = vor.u32 %v833_v46, %v660_v45  ;;  %v665_v52 = vor.u32 %v832_v47, %v662_v48  ;;  %v648_v54 = vld [vmem:[%s1294_s1 + $0x18] sm:$0xf]  ;;  %v829_v56 = vld [vmem:[%s1294_s1 + $0x1c] sm:$0xf] }
  0x12   :  { %245 = vmatpush.bf16.msra.mxu2 %v705_v26  ;;  %v669_v53 = vor.u32 %v834_v50, %v668_v49  ;;  %v830_v55 = vld [vmem:[%s1294_s1 + $0x20] sm:$0xf0]  ;;  %v650_v57 = vld [vmem:[%s1294_s1 + $0x24] sm:$0xf0]  ;;  %v656_v58 = vld [vmem:[%s1294_s1 + $0x20] sm:$0xf]  ;;  %v51_v26 = vlaneseq }
  0x13   :  { %v831_v59 = vld [vmem:[%s1294_s1 + $0x28] sm:$0xf0]  ;;  %v649_v60 = vor.u32 %v830_v55, %v648_v54  ;;  %v653_v61 = vor.u32 %v829_v56, %v650_v57  ;;  %v636_v63 = vld [vmem:[%s1294_s1] sm:$0xf]  ;;  %v826_v1 = vld [vmem:[%s1294_s1 + $0x4] sm:$0xf] }
  0x14   :  { %218 = vmatpush.bf16.msra.mxu0 %v685_v33  ;;  %v657_v62 = vor.u32 %v831_v59, %v656_v58  ;;  %v827_v0 = vld [vmem:[%s1294_s1 + $0x8] sm:$0xf0]  ;;  %v638_v2 = vld [vmem:[%s1294_s1 + $0xc] sm:$0xf0]  ;;  %v644_v3 = vld [vmem:[%s1294_s1 + $0x8] sm:$0xf] }
  0x15   :  { %232 = vmatpush.bf16.msra.mxu1 %v689_v34  ;;  %v828_v4 = vld [vmem:[%s1294_s1 + $0x10] sm:$0xf0]  ;;  %v637_v5 = vor.u32 %v827_v0, %v636_v63  ;;  %v1085_v6 = vld [vmem:[%s1293_s0] sm:$0xff]  ;;  %v1090_v7 = vld [vmem:[%s1293_s0 + $0x8] sm:$0xff]  ;;  %v641_v8 = vor.u32 %v826_v1, %v638_v2  ;;  %v1094_v29 = vshrl.u32 %v51_v26, 7  ;;  %vm297_vm4 = vcmask 1040384  }
  0x16   :  { %246 = vmatpush.bf16.msra.mxu2 %v693_v35  ;;  %v645_v9 = vor.u32 %v828_v4, %v644_v3  ;;  %v54_v10 = vpack.c.bf16 %v1090_v7, %v1085_v6  ;;  %v50_v11 = vld [vmem:[#allocation2 + $0x78] sm:$0xff]  ;;  %v49_v12 = vld [vmem:[#allocation2 + $0x70] sm:$0xff]  ;;  %v48_v13 = vld [vmem:[#allocation2 + $0x68] sm:$0xff] }
  0x17   :  { %299 = vmatpush.msra.mxu3 %v50_v11  ;;  %v47_v14 = vld [vmem:[#allocation2 + $0x60] sm:$0xff]  ;;  %v46_v15 = vld [vmem:[#allocation2 + $0x58] sm:$0xff]  ;;  %v45_v16 = vld [vmem:[#allocation2 + $0x50] sm:$0xff]  ;;  %vm259_vm0 = vcmp.lt.s32.totalorder %v1094_v29, 1  ;;  %vm262_vm1 = vcmp.eq.s32.totalorder %v1094_v29, 0  ;;  %v1101_v37 = vadd.s32 8, %v1094_v29 }
  0x18   :  { %219 = vmatpush.bf16.msra.mxu0 %v673_v42  ;;  %v44_v17 = vld [vmem:[#allocation2 + $0x48] sm:$0xff]  ;;  %v43_v18 = vld [vmem:[#allocation2 + $0x40] sm:$0xff]  ;;  %v42_v19 = vld [vmem:[#allocation2 + $0x38] sm:$0xff]  ;;  %vm269_vm2 = vcmp.lt.s32.totalorder %v1094_v29, 7 }
  0x19   :  { %233 = vmatpush.bf16.msra.mxu1 %v677_v43  ;;  %300 = vmatpush.msra.mxu3 %v49_v12  ;;  %v41_v20 = vld [vmem:[#allocation2 + $0x30] sm:$0xff]  ;;  %v40_v21 = vld [vmem:[#allocation2 + $0x28] sm:$0xff]  ;;  %v39_v22 = vld [vmem:[#allocation2 + $0x20] sm:$0xff]  ;;  %vm273_vm3 = vcmp.eq.s32.totalorder %v1101_v37, 15 }
  0x1a   :  { %247 = vmatpush.bf16.msra.mxu2 %v681_v44  ;;  %v38_v23 = vld [vmem:[#allocation2 + $0x18] sm:$0xff]  ;;  %v37_v24 = vld [vmem:[#allocation2 + $0x10] sm:$0xff]  ;;  %v36_v27 = vld [vmem:[#allocation2 + $0x8] sm:$0xff] }
  0x1b   :  { %301 = vmatpush.msra.mxu3 %v48_v13  ;;  %v35_v28 = vld [vmem:[#allocation2] sm:$0xff] }
  0x1c   :  { %220 = vmatpush.bf16.msra.mxu0 %v661_v51  ;;  %v866_v26 = vld [vmem:[%s1295_s2 + $0x80] sm:$0xf0] }
  0x1d   :  { %234 = vmatpush.bf16.msra.mxu1 %v665_v52  ;;  %302 = vmatpush.msra.mxu3 %v47_v14 }
  0x1e   :  { %248 = vmatpush.bf16.msra.mxu2 %v669_v53 }
  0x1f   :  { %303 = vmatpush.msra.mxu3 %v46_v15 }
  0x20   :  { %221 = vmatpush.bf16.msra.mxu0 %v649_v60 }
  0x21   :  { %235 = vmatpush.bf16.msra.mxu1 %v653_v61  ;;  %304 = vmatpush.msra.mxu3 %v45_v16 }
  0x22   :  { %249 = vmatpush.bf16.msra.mxu2 %v657_v62 }
  0x23   :  { %305 = vmatpush.msra.mxu3 %v44_v17 }
  0x24   :  { %222 = vmatpush.bf16.msra.mxu0 %v637_v5  ;;  %v816_v5 = vld [vmem:[%s1295_s2 + $0xa8] sm:$0xf] }
  0x25   :  { %236 = vmatpush.bf16.msra.mxu1 %v641_v8  ;;  %306 = vmatpush.msra.mxu3 %v43_v18  ;;  %v872_v8 = vld [vmem:[%s1295_s2 + $0xb0] sm:$0xf0] }
  0x26   :  { %250 = vmatpush.bf16.msra.mxu2 %v645_v9  ;;  %v871_v9 = vld [vmem:[%s1295_s2 + $0xac] sm:$0xf] }
  0x27   :  { %223 = vmatmul.bf16.vlgmr.msra.gmra.mxu0 %v54_v10  ;;  %307 = vmatpush.msra.mxu3 %v42_v19 }
  0x28   :  { %237 = vmatmul.bf16.vlgmr.msra.gmra.mxu1 %v54_v10 }
  0x29   :  { %251 = vmatmul.bf16.vlgmr.msra.gmra.mxu2 %v54_v10  ;;  %308 = vmatpush.msra.mxu3 %v41_v20  ;;  %v817_v10 = vor.u32 %v872_v8, %v816_v5  ;;  %v746_v5 = vld [vmem:[%s1295_s2 + $0x24] sm:$0xf0]  ;;  %v752_v8 = vld [vmem:[%s1295_s2 + $0x20] sm:$0xf] }
  0x2b   :  { %309 = vmatpush.msra.mxu3 %v40_v21  ;;  %505 = vmatpush.bf16.msrb.mxu0 %v817_v10 }
  0x2d   :  { %310 = vmatpush.msra.mxu3 %v39_v22 }
  0x2f   :  { %311 = vmatpush.msra.mxu3 %v38_v23 }
  0x31   :  { %312 = vmatpush.msra.mxu3 %v37_v24 }
  0x33   :  { %313 = vmatpush.msra.mxu3 %v36_v27 }
  0x35   :  { %314 = vmatpush.msra.mxu3 %v35_v28 }
  0x37   :  { %582 = vmatpush.msrb.mxu3 %v50_v11  ;;  %v818_v11 = vld [vmem:[%s1295_s2 + $0xb4] sm:$0xf0] }
  0x39   :  { %583 = vmatpush.msrb.mxu3 %v49_v12  ;;  %v824_v12 = vld [vmem:[%s1295_s2 + $0xb0] sm:$0xf] }
  0x3b   :  { %584 = vmatpush.msrb.mxu3 %v48_v13  ;;  %v873_v13 = vld [vmem:[%s1295_s2 + $0xb8] sm:$0xf0] }
  0x3d   :  { %585 = vmatpush.msrb.mxu3 %v47_v14  ;;  %v821_v14 = vor.u32 %v871_v9, %v818_v11  ;;  %v855_v9 = vld [vmem:[%s1295_s2 + $0x28] sm:$0xf0] }
  0x3e   :  { %v753_v11 = vor.u32 %v855_v9, %v752_v8 }
  0x3f   :  { %586 = vmatpush.msrb.mxu3 %v46_v15  ;;  %v825_v15 = vor.u32 %v873_v13, %v824_v12  ;;  %519 = vmatpush.bf16.msrb.mxu1 %v821_v14  ;;  %v732_v12 = vld [vmem:[%s1295_s2] sm:$0xf]  ;;  %v851_v13 = vld [vmem:[%s1295_s2 + $0x8] sm:$0xf0]  ;;  %v850_v14 = vld [vmem:[%s1295_s2 + $0x4] sm:$0xf] }
  0x41   :  { %587 = vmatpush.msrb.mxu3 %v45_v16  ;;  %533 = vmatpush.bf16.msrb.mxu2 %v825_v15  ;;  %v804_v16 = vld [vmem:[%s1295_s2 + $0x90] sm:$0xf] }
  0x42   :  { %v734_v15 = vld [vmem:[%s1295_s2 + $0xc] sm:$0xf0] }
  0x43   :  { %588 = vmatpush.msrb.mxu3 %v44_v17  ;;  %v869_v17 = vld [vmem:[%s1295_s2 + $0x98] sm:$0xf0] }
  0x45   :  { %589 = vmatpush.msrb.mxu3 %v43_v18  ;;  %v868_v18 = vld [vmem:[%s1295_s2 + $0x94] sm:$0xf] }
  0x47   :  { %590 = vmatpush.msrb.mxu3 %v42_v19  ;;  %v805_v19 = vor.u32 %v869_v17, %v804_v16  ;;  %v740_v16 = vld [vmem:[%s1295_s2 + $0x8] sm:$0xf]  ;;  %v852_v17 = vld [vmem:[%s1295_s2 + $0x10] sm:$0xf0] }
  0x49   :  { %591 = vmatpush.msrb.mxu3 %v41_v20  ;;  %v806_v20 = vld [vmem:[%s1295_s2 + $0x9c] sm:$0xf0]  ;;  %506 = vmatpush.bf16.msrb.mxu0 %v805_v19  ;;  %v737_v19 = vor.u32 %v850_v14, %v734_v15 }
  0x4b   :  { %592 = vmatpush.msrb.mxu3 %v40_v21  ;;  %v812_v21 = vld [vmem:[%s1295_s2 + $0x98] sm:$0xf] }
  0x4d   :  { %593 = vmatpush.msrb.mxu3 %v39_v22  ;;  %v870_v22 = vld [vmem:[%s1295_s2 + $0xa0] sm:$0xf0] }
  0x4f   :  { %594 = vmatpush.msrb.mxu3 %v38_v23  ;;  %v809_v23 = vor.u32 %v868_v18, %v806_v20  ;;  %v733_v18 = vor.u32 %v851_v13, %v732_v12  ;;  %v741_v20 = vor.u32 %v852_v17, %v740_v16 }
  0x51   :  { %595 = vmatpush.msrb.mxu3 %v37_v24  ;;  %v813_v24 = vor.u32 %v870_v22, %v812_v21  ;;  %520 = vmatpush.bf16.msrb.mxu1 %v809_v23 }
  0x53   :  { %596 = vmatpush.msrb.mxu3 %v36_v27  ;;  %534 = vmatpush.bf16.msrb.mxu2 %v813_v24  ;;  %v865_v27 = vld [vmem:[%s1295_s2 + $0x7c] sm:$0xf] }
  0x55   :  { %597 = vmatpush.msrb.mxu3 %v35_v28 }
  0xa4   :  { %v224_v25 = vpop.f32.mrf.mxu0 }
  0xa5   :  { %v238_v30 = vpop.f32.mrf.mxu1  ;;  %v257_v33 = vrot.slane %v224_v25, 7  ;;  %v264_v36 = vperm.slane %v224_v25, 1  ;;  %v792_v25 = vld [vmem:[%s1295_s2 + $0x78] sm:$0xf] }
  0xa6   :  { %v793_v28 = vor.u32 %v866_v26, %v792_v25 }
  0xa8   :  { %507 = vmatpush.bf16.msrb.mxu0 %v793_v28 }
  0xac   :  { %v252_v31 = vpop.f32.mrf.mxu2  ;;  %v226_v32 = vpop.f32.mrf.mxu0 }
  0xad   :  { %v258_v34 = vrot.slane %v226_v32, 7  ;;  %v267_v41 = vrot.slane %v252_v31, 1  ;;  %v240_v45 = vpop.f32.mrf.mxu1  ;;  %v800_v31 = vld [vmem:[%s1295_s2 + $0x80] sm:$0xf]  ;;  %v867_v32 = vld [vmem:[%s1295_s2 + $0x88] sm:$0xf0] }
  0xaf   :  { %v261_v35 = vsel %vm259_vm0, %v258_v34, %v257_v33  ;;  %v260_v39 = vsel %vm259_vm0, %v257_v33, %v258_v34  ;;  %v801_v34 = vor.u32 %v867_v32, %v800_v31 }
  0xb0   :  { %v265_v38 = vsel %vm262_vm1, %v264_v36, %v261_v35  ;;  %v278_v46 = vadd.f32 %v260_v39, %v240_v45  ;;  %v780_v35 = vld [vmem:[%s1295_s2 + $0x60] sm:$0xf]  ;;  %v863_v36 = vld [vmem:[%s1295_s2 + $0x68] sm:$0xf0]  ;;  %v768_v45 = vld [vmem:[%s1295_s2 + $0x48] sm:$0xf] }
  0xb1   :  { %v277_v44 = vadd.f32 %v265_v38, %v238_v30  ;;  %v794_v30 = vld [vmem:[%s1295_s2 + $0x84] sm:$0xf0]  ;;  %535 = vmatpush.bf16.msrb.mxu2 %v801_v34  ;;  %v862_v38 = vld [vmem:[%s1295_s2 + $0x64] sm:$0xf]  ;;  %v781_v39 = vor.u32 %v863_v36, %v780_v35 }
  0xb2   :  { %v797_v33 = vor.u32 %v865_v27, %v794_v30 }
  0xb3   :  { %508 = vmatpush.bf16.msrb.mxu0 %v781_v39 }
  0xb4   :  { %v254_v40 = vpop.f32.mrf.mxu2  ;;  %521 = vmatpush.bf16.msrb.mxu1 %v797_v33 }
  0xb5   :  { %v268_v42 = vrot.slane %v254_v40, 1  ;;  %v274_v43 = vperm.slane %v254_v40, 6  ;;  %v782_v40 = vld [vmem:[%s1295_s2 + $0x6c] sm:$0xf0] }
  0xb7   :  { %v270_v47 = vsel %vm269_vm2, %v267_v41, %v268_v42  ;;  %v271_v48 = vsel %vm269_vm2, %v268_v42, %v267_v41  ;;  %v788_v41 = vld [vmem:[%s1295_s2 + $0x68] sm:$0xf]  ;;  %v864_v42 = vld [vmem:[%s1295_s2 + $0x70] sm:$0xf0] }
  0xb8   :  { %v276_v49 = vsel %vm273_vm3, %v274_v43, %v271_v48  ;;  %v1115_v50 = vadd.f32 %v277_v44, %v270_v47  ;;  %v785_v43 = vor.u32 %v862_v38, %v782_v40  ;;  %v789_v44 = vor.u32 %v864_v42, %v788_v41  ;;  %v859_v47 = vld [vmem:[%s1295_s2 + $0x4c] sm:$0xf] }
  0xb9   :  { %v1117_v51 = vadd.f32 %v278_v46, %v276_v49  ;;  %v860_v46 = vld [vmem:[%s1295_s2 + $0x50] sm:$0xf0]  ;;  %v770_v49 = vld [vmem:[%s1295_s2 + $0x54] sm:$0xf0] }
  0xba   :  { %v288_v52 = vmul.f32 %v1115_v50, %v1115_v50  ;;  %522 = vmatpush.bf16.msrb.mxu1 %v785_v43  ;;  %536 = vmatpush.bf16.msrb.mxu2 %v789_v44  ;;  %v769_v48 = vor.u32 %v860_v46, %v768_v45 }
  0xbb   :  { %v289_v53 = vmul.f32 %v1117_v51, %v1117_v51  ;;  %v281_v54 = vadd.f32 %v1117_v51, %v1115_v50 }
  0xbc   :  { %509 = vmatpush.bf16.msrb.mxu0 %v769_v48 }
  0xbd   :  { %v282_v55 = vrot.slane %v281_v54, 4  ;;  %v290_v56 = vadd.f32 %v289_v53, %v288_v52  ;;  %v776_v52 = vld [vmem:[%s1295_s2 + $0x50] sm:$0xf]  ;;  %v861_v53 = vld [vmem:[%s1295_s2 + $0x58] sm:$0xf0] }
  0xbf   :  { %v283_v57 = vadd.f32 %v282_v55, %v281_v54  ;;  %v291_v58 = vrot.slane %v290_v56, 4  ;;  %v773_v54 = vor.u32 %v859_v47, %v770_v49  ;;  %v777_v55 = vor.u32 %v861_v53, %v776_v52 }
  0xc1   :  { %v284_v59 = vrot.slane %v283_v57, 2  ;;  %v292_v60 = vadd.f32 %v291_v58, %v290_v56  ;;  %523 = vmatpush.bf16.msrb.mxu1 %v773_v54  ;;  %537 = vmatpush.bf16.msrb.mxu2 %v777_v55  ;;  %v756_v56 = vld [vmem:[%s1295_s2 + $0x30] sm:$0xf]  ;;  %v856_v58 = vld [vmem:[%s1295_s2 + $0x34] sm:$0xf] }
  0xc3   :  { %v285_v61 = vadd.f32 %v284_v59, %v283_v57  ;;  %v293_v62 = vrot.slane %v292_v60, 2  ;;  %v857_v57 = vld [vmem:[%s1295_s2 + $0x38] sm:$0xf0] }
  0xc4   :  { %v757_v59 = vor.u32 %v857_v57, %v756_v56 }
  0xc5   :  { %v286_v63 = vrot.slane %v285_v61, 1  ;;  %v294_v0 = vadd.f32 %v293_v62, %v292_v60  ;;  %v758_v60 = vld [vmem:[%s1295_s2 + $0x3c] sm:$0xf0]  ;;  %v858_v62 = vld [vmem:[%s1295_s2 + $0x40] sm:$0xf0] }
  0xc6   :  { %510 = vmatpush.bf16.msrb.mxu0 %v757_v59 }
  0xc7   :  { %v295_v1 = vrot.slane %v294_v0, 1  ;;  %v287_v2 = vadd.f32 %v286_v63, %v285_v61  ;;  %v764_v61 = vld [vmem:[%s1295_s2 + $0x38] sm:$0xf]  ;;  %v761_v63 = vor.u32 %v856_v58, %v758_v60 }
  0xc9   :  { %v296_v3 = vadd.f32 %v295_v1, %v294_v0  ;;  %v765_v0 = vor.u32 %v858_v62, %v764_v61  ;;  %v744_v1 = vld [vmem:[%s1295_s2 + $0x18] sm:$0xf]  ;;  %524 = vmatpush.bf16.msrb.mxu1 %v761_v63 }
  0xcb   :  { %v298_v4 = vsel %vm297_vm4, %v287_v2, %v296_v3  ;;  %v854_v2 = vld [vmem:[%s1295_s2 + $0x20] sm:$0xf0]  ;;  %v853_v3 = vld [vmem:[%s1295_s2 + $0x1c] sm:$0xf]  ;;  %538 = vmatpush.bf16.msrb.mxu2 %v765_v0 }
  0xcc   :  { %315 = vmatmul.f32.vlgmr.msra.gmra.mxu3 %v298_v4  ;;  %v745_v4 = vor.u32 %v854_v2, %v744_v1  ;;  %v749_v10 = vor.u32 %v853_v3, %v746_v5 }
  0xce   :  { %511 = vmatpush.bf16.msrb.mxu0 %v745_v4  ;;  %525 = vmatpush.bf16.msrb.mxu1 %v749_v10 }
  0xcf   :  { %539 = vmatpush.bf16.msrb.mxu2 %v753_v11 }
  0xd2   :  { %512 = vmatpush.bf16.msrb.mxu0 %v733_v18  ;;  %526 = vmatpush.bf16.msrb.mxu1 %v737_v19 }
  0xd3   :  { %540 = vmatpush.bf16.msrb.mxu2 %v741_v20 }
 0x14f   :  { %v316_v21 = vpop.f32.mrf.mxu3 }
 0x150   :  { %v319_v22 = vmul.f32 %v316_v21, %v316_v21  ;;  %v325_v33 = vperm.slane %v316_v21, 0 }
 0x152   :  { %v321_v23 = vrot.slane %v319_v22, 7  ;;  %v326_v36 = vsub.f32 %v1115_v50, %v325_v33  ;;  %v327_v38 = vsub.f32 %v1117_v51, %v325_v33 }
 0x154   :  { %v323_v24 = vsub.f32 %v316_v21, %v321_v23 }
 0x156   :  { %v324_v25 = vmax.f32 %v323_v24, 0.0 }
 0x158   :  { %v328_v26 = vadd.f32 1e-05, %v324_v25 }
 0x15a   :  { %877 = vrsqrt.f32 %v328_v26  ;;  %vm335_vm6 = vweird.f32 %v328_v26 }
 0x160   :  { %v878_v27 = vpop.eup %877 }
 0x161   :  { %v330_v28 = vmul.f32 %v878_v27, %v328_v26  ;;  %vm336_vm5 = vweird.f32 %v878_v27 }
 0x162   :  { %vm337_vm7 = vmor %vm335_vm6, %vm336_vm5 }
 0x163   :  { %v331_v30 = vmul.f32 %v878_v27, %v330_v28 }
 0x165   :  { %v332_v31 = vmul.f32 0.5, %v331_v30 }
 0x167   :  { %v333_v32 = vsub.f32 1.5, %v332_v31 }
 0x169   :  { %v334_v34 = vmul.f32 %v878_v27, %v333_v32 }
 0x16b   :  { %v338_v35 = vsel %vm337_vm7, %v878_v27, %v334_v34 }
 0x16c   :  { %v339_v39 = vperm.slane %v338_v35, 1 }
 0x16e   :  { %v340_v40 = vmul.f32 %v339_v39, %v326_v36  ;;  %v341_v41 = vmul.f32 %v339_v39, %v327_v38 }
 0x170   :  { %v342_v42 = vmax.f32 %v340_v40, 0.0  ;;  %v343_v43 = vmax.f32 %v341_v41, 0.0 }
 0x172   :  { %v344_v44 = vpack.c.bf16 %v343_v43, %v342_v42 }
 0x174   :  { %513 = vmatmul.bf16.vlgmr.msrb.gmra.mxu0 %v344_v44  ;;  %527 = vmatmul.bf16.vlgmr.msrb.gmra.mxu1 %v344_v44 }
 0x175   :  { %541 = vmatmul.bf16.vlgmr.msrb.gmra.mxu2 %v344_v44 }
 0x1f1   :  { %v514_v45 = vpop.f32.mrf.mxu0  ;;  %v528_v46 = vpop.f32.mrf.mxu1 }
 0x1f2   :  { %v547_v49 = vrot.slane %v514_v45, 7  ;;  %v551_v53 = vperm.slane %v514_v45, 1 }
 0x1f8   :  { %v542_v47 = vpop.f32.mrf.mxu2 }
 0x1f9   :  { %v516_v48 = vpop.f32.mrf.mxu0  ;;  %v554_v56 = vrot.slane %v542_v47, 1  ;;  %v530_v60 = vpop.f32.mrf.mxu1 }
 0x1fa   :  { %v548_v52 = vrot.slane %v516_v48, 7 }
 0x1fc   :  { %v550_v50 = vsel %vm259_vm0, %v548_v52, %v547_v49  ;;  %v549_v54 = vsel %vm259_vm0, %v547_v49, %v548_v52 }
 0x1fd   :  { %v552_v51 = vsel %vm262_vm1, %v551_v53, %v550_v50  ;;  %v562_v61 = vadd.f32 %v549_v54, %v530_v60 }
 0x1fe   :  { %v561_v59 = vadd.f32 %v552_v51, %v528_v46 }
 0x200   :  { %v544_v55 = vpop.f32.mrf.mxu2 }
 0x201   :  { %v555_v57 = vrot.slane %v544_v55, 1  ;;  %v558_v58 = vperm.slane %v544_v55, 6 }
 0x203   :  { %v556_v62 = vsel %vm269_vm2, %v554_v56, %v555_v57  ;;  %v557_v63 = vsel %vm269_vm2, %v555_v57, %v554_v56 }
 0x204   :  { %v560_v0 = vsel %vm273_vm3, %v558_v58, %v557_v63  ;;  %v563_v1 = vadd.f32 %v561_v59, %v556_v62 }
 0x205   :  { %v564_v2 = vadd.f32 %v562_v61, %v560_v0 }
 0x206   :  { %v572_v3 = vmul.f32 %v563_v1, %v563_v1 }
 0x207   :  { %v565_v4 = vadd.f32 %v564_v2, %v563_v1  ;;  %v573_v5 = vmul.f32 %v564_v2, %v564_v2 }
 0x209   :  { %v566_v8 = vrot.slane %v565_v4, 4  ;;  %v574_v9 = vadd.f32 %v573_v5, %v572_v3 }
 0x20b   :  { %v567_v10 = vadd.f32 %v566_v8, %v565_v4  ;;  %v575_v11 = vrot.slane %v574_v9, 4 }
 0x20d   :  { %v568_v12 = vrot.slane %v567_v10, 2  ;;  %v576_v13 = vadd.f32 %v575_v11, %v574_v9 }
 0x20f   :  { %v569_v14 = vadd.f32 %v568_v12, %v567_v10  ;;  %v577_v15 = vrot.slane %v576_v13, 2 }
 0x211   :  { %v570_v16 = vrot.slane %v569_v14, 1  ;;  %v578_v17 = vadd.f32 %v577_v15, %v576_v13 }
 0x213   :  { %v579_v29 = vrot.slane %v578_v17, 1  ;;  %v571_v18 = vadd.f32 %v570_v16, %v569_v14 }
 0x215   :  { %v580_v19 = vadd.f32 %v579_v29, %v578_v17 }
 0x217   :  { %v581_v37 = vsel %vm297_vm4, %v571_v18, %v580_v19 }
 0x218   :  { %598 = vmatmul.f32.vlgmr.msrb.gmra.mxu3 %v581_v37 }
 0x29b   :  { %v599_v20 = vpop.f32.mrf.mxu3 }
 0x29c   :  { %v602_v21 = vmul.f32 %v599_v20, %v599_v20  ;;  %v608_v32 = vperm.slane %v599_v20, 0 }
 0x29e   :  { %v604_v22 = vrot.slane %v602_v21, 7  ;;  %v609_v35 = vsub.f32 %v563_v1, %v608_v32  ;;  %v610_v36 = vsub.f32 %v564_v2, %v608_v32 }
 0x2a0   :  { %v606_v23 = vsub.f32 %v599_v20, %v604_v22 }
 0x2a2   :  { %v607_v24 = vmax.f32 %v606_v23, 0.0 }
 0x2a4   :  { %v611_v25 = vadd.f32 1e-05, %v607_v24 }
 0x2a6   :  { %879 = vrsqrt.f32 %v611_v25  ;;  %vm618_vm9 = vweird.f32 %v611_v25 }
 0x2ac   :  { %v880_v26 = vpop.eup %879 }
 0x2ad   :  { %v613_v27 = vmul.f32 %v880_v26, %v611_v25  ;;  %vm619_vm8 = vweird.f32 %v880_v26 }
 0x2ae   :  { %vm620_vm10 = vmor %vm618_vm9, %vm619_vm8 }
 0x2af   :  { %v614_v28 = vmul.f32 %v880_v26, %v613_v27 }
 0x2b1   :  { %v615_v30 = vmul.f32 0.5, %v614_v28 }
 0x2b3   :  { %v616_v31 = vsub.f32 1.5, %v615_v30 }
 0x2b5   :  { %v617_v33 = vmul.f32 %v880_v26, %v616_v31 }
 0x2b7   :  { %v621_v34 = vsel %vm620_vm10, %v880_v26, %v617_v33 }
 0x2b8   :  { %v622_v38 = vperm.slane %v621_v34, 1 }
 0x2ba   :  { %v623_v39 = vmul.f32 %v622_v38, %v609_v35  ;;  %v624_v40 = vmul.f32 %v622_v38, %v610_v36 }
 0x2bc   :  { %v625_v41 = vadd.f32 %v623_v39, %v1085_v6  ;;  %v626_v42 = vadd.f32 %v624_v40, %v1090_v7 }
 0x2be   :  { %627 = vst [vmem:[%s1297_s4] sm:$0xff] %v625_v41 }
 0x2bf   :  { %628 = vst [vmem:[%s1297_s4 + $0x8] sm:$0xff] %v626_v42 }
 0x2c0   :  { %633 = vsyncpa [#allocation3], 1 }

</bundles_post_ra>
